<compile_context>
chip_gen: v5e
topology: v5e:2x2
jax: 0.10.0
libtpu: 0.0.40
codegen_flags: <defaults>
</compile_context>

<pallas_src>
import jax
import jax.numpy as jnp
from jax.experimental import pallas as pl
from jax.experimental.pallas import tpu as pltpu

LANE = 1024      # lane-dense last dim (multiple of 128)
TILE_R = 512     # 512 x 1024 f32 = 2 MiB per block (double-buffered in+out ~ 8 MiB VMEM)


def linear_kernel(wb_ref, x_ref, o_ref):
    # wb_ref: (2,) f32 in SMEM -> [weight, bias]; x_ref/o_ref: (tile_r, LANE) VMEM tiles.
    w = wb_ref[0]
    b = wb_ref[1]
    o_ref[...] = x_ref[...] * w + b


def layer_linear_regression(x, weight, bias):
    """Pallas equivalent of nn.Linear(1, 1) forward.

    x:      (N, 1) float32
    weight: (1, 1) float32   (PyTorch layout: [out_features, in_features])
    bias:   (1,)   float32
    returns (N, 1) float32
    """
    n, f = x.shape
    assert f == 1 and weight.shape == (1, 1) and bias.shape == (1,)
    orig_dtype = x.dtype

    # ---- lane-dense repack: (N, 1) -> (rows_padded, LANE), pad ragged tail ----
    xf = x.reshape(-1).astype(jnp.float32)
    rows = pl.cdiv(n, LANE)                       # >= 1 (static Python int)
    tile_r = min(TILE_R, rows)                    # small-N: one full-array block
    rows_padded = tile_r * pl.cdiv(rows, tile_r)  # make all grid blocks full
    total = rows_padded * LANE
    if total != n:
        # Padded tail is computed then dropped by the final slice; no masking needed.
        xf = jnp.pad(xf, (0, total - n))
    x2 = xf.reshape(rows_padded, LANE)

    # Pack scalar params into one tiny 1-D SMEM array (avoids 2-D SMEM padding).
    wb = jnp.stack(
        [weight.reshape(()), bias.reshape(())]
    ).astype(jnp.float32)                         # shape (2,)

    grid = (rows_padded // tile_r,)

    cost = pl.CostEstimate(
        flops=2 * total,            # one mul + one add per element
        transcendentals=0,
        bytes_accessed=2 * 4 * total,   # f32 read + f32 write
    )

    out = pl.pallas_call(
        linear_kernel,
        out_shape=jax.ShapeDtypeStruct((rows_padded, LANE), jnp.float32),
        grid=grid,
        in_specs=[
            pl.BlockSpec(memory_space=pltpu.MemorySpace.SMEM),   # packed [w, b]
            pl.BlockSpec((tile_r, LANE), lambda i: (i, 0)),      # x row-tile
        ],
        out_specs=pl.BlockSpec((tile_r, LANE), lambda i: (i, 0)),
        compiler_params=pltpu.CompilerParams(
            dimension_semantics=("parallel",),
        ),
        cost_estimate=cost,
    )(wb, x2)

    # ---- unpack: drop padding, restore (N, 1) ----
    return out.reshape(-1)[:n].reshape(n, 1).astype(orig_dtype)


if __name__ == "__main__":
    key = jax.random.PRNGKey(0)
    k_w, k_b, k_x1, k_x2 = jax.random.split(key, 4)

    # Deterministic parameter init mimicking nn.Linear(1, 1):
    # uniform(-1/sqrt(fan_in), 1/sqrt(fan_in)) with fan_in = 1.
    weight = jax.random.uniform(k_w, (1, 1), jnp.float32, minval=-1.0, maxval=1.0)
    bias = jax.random.uniform(k_b, (1,), jnp.float32, minval=-1.0, maxval=1.0)

    # Small batch of scalar features (exercises the padded, single-block path).
    x_small = jax.random.normal(k_x1, (8, 1), jnp.float32)
    y_small = layer_linear_regression(x_small, weight, bias)
    jax.block_until_ready(y_small)
    ref_small = x_small @ weight.T + bias
    assert y_small.shape == ref_small.shape
    assert jnp.allclose(y_small, ref_small, atol=1e-6, rtol=1e-6)

    # Ragged N > LANE (exercises multi-row slab + tail padding), still small.
    x_big = jax.random.normal(k_x2, (3000, 1), jnp.float32)
    y_big = layer_linear_regression(x_big, weight, bias)
    jax.block_until_ready(y_big)
    ref_big = x_big @ weight.T + bias
    assert y_big.shape == ref_big.shape
    assert jnp.allclose(y_big, ref_big, atol=1e-6, rtol=1e-6)

    print("KERNEL_OK")
</pallas_src>

<mosaic_0001>
module attributes {stable_mosaic.version = 11 : i64} {
  func.func @linear_kernel(%arg0: i32, %arg1: memref<2xf32, #tpu.memory_space<smem>>, %arg2: memref<1x1024xf32, #tpu.memory_space<vmem>>, %arg3: memref<1x1024xf32, #tpu.memory_space<vmem>>) attributes {dimension_semantics = [#tpu.dimension_semantics<parallel>], iteration_bounds = array<i64: 1>, scalar_prefetch = 0 : i64, scratch_operands = 0 : i64, tpu.core_type = #tpu.core_type<tc>, window_params = [{transform_indices = @transform_0, window_bounds = array<i64: 2>}, {transform_indices = @transform_1, window_bounds = array<i64: 1, 1024>}, {transform_indices = @transform_2, window_bounds = array<i64: 1, 1024>}]} {
    %c0 = arith.constant 0 : index
    %0 = memref.load %arg1[%c0] : memref<2xf32, #tpu.memory_space<smem>>
    %c1 = arith.constant 1 : index
    %1 = memref.load %arg1[%c1] : memref<2xf32, #tpu.memory_space<smem>>
    %c0_0 = arith.constant 0 : index
    %c0_1 = arith.constant 0 : index
    %2 = vector.load %arg2[%c0_0, %c0_1] : memref<1x1024xf32, #tpu.memory_space<vmem>>, vector<1x1024xf32>
    %3 = vector.broadcast %0 : f32 to vector<1x1024xf32>
    %4 = arith.mulf %2, %3 : vector<1x1024xf32>
    %5 = vector.broadcast %1 : f32 to vector<1x1024xf32>
    %6 = arith.addf %4, %5 : vector<1x1024xf32>
    %c0_2 = arith.constant 0 : index
    %c0_3 = arith.constant 0 : index
    %7 = vector.load %arg3[%c0_2, %c0_3] : memref<1x1024xf32, #tpu.memory_space<vmem>>, vector<1x1024xf32>
    tpu.vector_store %arg3[%c0_2, %c0_3], %6 {strides = array<i32>} : memref<1x1024xf32, #tpu.memory_space<vmem>>, vector<1x1024xf32>,
    return
  }
  func.func @transform_0(%arg0: i32) -> i32 {
    %c0_i32 = arith.constant 0 : i32
    %c0_i32_0 = arith.constant 0 : i32
    return %c0_i32 : i32
  }
  func.func @transform_1(%arg0: i32) -> (i32, i32) {
    %c0_i32 = arith.constant 0 : i32
    %c0_i32_0 = arith.constant 0 : i32
    return %arg0, %c0_i32 : i32, i32
  }
  func.func @transform_2(%arg0: i32) -> (i32, i32) {
    %c0_i32 = arith.constant 0 : i32
    %c0_i32_0 = arith.constant 0 : i32
    return %arg0, %c0_i32 : i32, i32
  }
}

</mosaic_0001>

<bundles_post_ra>
// kernel: tpu_custom_call.1
= control target key start
LH: loop header
LB: loop body
LE: loop exit
PB: predicated region body
PF: predicated region fallthrough
CT: control target
= control target key end

     0   :  { %7 = vsyncpa [#allocation5], 0  ;;  %s162_s0 = inlined_call_operand.hbm [shape: f32[2], index: 0, kind: input, shape index: {}]   ;;  %s163_s1 = inlined_call_operand.hbm [shape: f32[1,1024], index: 1, kind: input, shape index: {}]   ;;  %s164_s2 = inlined_call_operand.hbm [shape: f32[1,1024], index: 2, kind: output, shape index: {}]  }
   0x1   :  { %8 = vsyncpa [#allocation3], 0 }
   0x2   :  { %9 = vsyncpa [#allocation4], 0  ;;  %s15_s11 = sshll.u32 %s162_s0, 4  ;;  %s24_s14 = sshll.u32 %s163_s1, 4  ;;  %s16_s11 = int_to_ptr.hbm [resolvable:$true] %s15_s11  ;;  %s25_s14 = int_to_ptr.hbm [resolvable:$true] %s24_s14 }
   0x3   :  { %s135_s15 = smov [#allocation2]   ;;  %s136_s16 = smov [#allocation6]  }
   0x4   :  { %18 = dma.hbm_to_smem %s16_s11, 16, %s135_s15, [#allocation5]  }
   0x5   :  { %s26_s17 = sshll.u32 %s136_s16, 4  ;;  %s27_s17 = int_to_ptr.vmem [resolvable:$true] %s26_s17 }
   0x6   :  { %29 = dma.hbm_to_vmem [thread:$0]  %s25_s14, 128, %s27_s17, [#allocation3]  }
   0x7   :  { %129 = dma.done.wait [#allocation5], 16  }
   0x8   :  { %130 = vsyncadd [#allocation5], 4294967280 }
   0x9   :  { %131 = dma.done.wait [#allocation3], 128  }
   0xa   :  { %132 = vsyncadd [#allocation3], 4294967168 }
   0xb   :  { %38 = sfence }
   0xc   :  { %s39_s18 = sld [smem:[#allocation2]]  ;;  %v41_v0 = vld [vmem:[#allocation6] sm:$0xff]  ;;  %s137_s0 = smov [#allocation7]  }
   0xd   :  { %s65_s19 = sld [smem:[#allocation2 + $0x1]]  ;;  %s52_s20 = sshll.u32 %s137_s0, 4  ;;  %s53_s20 = int_to_ptr.vmem [resolvable:$true] %s52_s20 }
   0xe   :  { %s54_s22 = sshll.u32 %s164_s2, 4  ;;  %s55_s22 = int_to_ptr.hbm [resolvable:$true] %s54_s22 }
  0x12   :  { %v42_v1 = vstv %s39_s18 }
  0x13   :  { %v43_v2 = vmul.f32 %v42_v1, %v41_v0  ;;  %v44_v3 = vstv %s65_s19 }
  0x15   :  { %v45_v4 = vadd.f32 %v44_v3, %v43_v2 }
  0x17   :  { %46 = vst [vmem:[#allocation7] sm:$0xff] %v45_v4 }
  0x18   :  { %57 = dma.vmem_to_hbm [thread:$0]  %s53_s20, 128, %s55_s22, [#allocation4]  }
  0x19   :  { %133 = dma.done.wait [#allocation4], 128  }
  0x1a   :  { %134 = vsyncadd [#allocation4], 4294967168 }
  0x1b   :  { %62 = vsyncpa [#allocation3], 1 }
  0x1c   :  { %63 = vsyncpa [#allocation4], 1 }
  0x1d   :  { %64 = vsyncpa [#allocation5], 1 }

</bundles_post_ra>
